<compile_context>
chip_gen: v7x
topology: tpu7x:2x2x1
jax: 0.10.0
libtpu: 0.0.40
codegen_flags: <defaults>
</compile_context>

<pallas_src>
import functools

import jax
import jax.numpy as jnp
from jax.experimental import pallas as pl
from jax.experimental.pallas import tpu as pltpu


_OUT_W = 8  # padded logits width: 4 real logits + 4 exact-zero lanes


def _round_up(x, m):
    return (x + m - 1) // m * m


# ----------------------------------------------------------------------------
# Kernel
# ----------------------------------------------------------------------------
def _content_moderator_kernel(xv_ref, xa_ref, xt_ref,
                              wv_ref, wa_ref, wt_ref,
                              w1_ref, w2_ref, w3_ref,
                              b_ref, out_ref, *, H, H2):
    f32 = jnp.float32
    bf16 = jnp.bfloat16

    # Modality encoders: relu(x @ W + b).  bf16 operands, f32 accumulation.
    v = jnp.maximum(
        jnp.dot(xv_ref[...], wv_ref[...], preferred_element_type=f32)
        + b_ref[0:1, 0:H], 0.0)
    a = jnp.maximum(
        jnp.dot(xa_ref[...], wa_ref[...], preferred_element_type=f32)
        + b_ref[1:2, 0:H], 0.0)
    t = jnp.maximum(
        jnp.dot(xt_ref[...], wt_ref[...], preferred_element_type=f32)
        + b_ref[2:3, 0:H], 0.0)

    # classifier.0: Linear(3H -> H) over cat([v, a, t]) expressed as a K-split
    # sum of three dots (no concatenation / relayout needed), then ReLU.
    h1 = (jnp.dot(v.astype(bf16), w1_ref[0:H, :], preferred_element_type=f32)
          + jnp.dot(a.astype(bf16), w1_ref[H:2 * H, :], preferred_element_type=f32)
          + jnp.dot(t.astype(bf16), w1_ref[2 * H:3 * H, :], preferred_element_type=f32)
          + b_ref[3:4, 0:H])
    h1 = jnp.maximum(h1, 0.0)

    # TODO(synk): nn.Dropout is identity in eval mode; training-mode dropout
    # (p=0.5 mask + 2x scale) is intentionally not applied here.

    # classifier.3: Linear(H -> H//2) + ReLU
    h2 = jnp.maximum(
        jnp.dot(h1.astype(bf16), w2_ref[...], preferred_element_type=f32)
        + b_ref[4:5, 0:H2], 0.0)

    # classifier.5: Linear(H//2 -> 4), emitted into an 8-lane block
    # (lanes 4..7 are exact zeros: zero weight cols + zero bias lanes).
    out_ref[...] = (
        jnp.dot(h2.astype(bf16), w3_ref[...], preferred_element_type=f32)
        + b_ref[5:6, 0:_OUT_W]
    ).astype(out_ref.dtype)


# ----------------------------------------------------------------------------
# Host-side parameter packing (done once)
# ----------------------------------------------------------------------------
def pack_params(p, video_dim, audio_dim, title_dim, hidden_dim):
    """bf16 exact-shape weights + one packed f32 bias array."""
    H = hidden_dim
    H2 = hidden_dim // 2
    bf16 = jnp.bfloat16

    wv = p["wv"].astype(bf16)                               # [Dv, H]
    wa = p["wa"].astype(bf16)                               # [Da, H]
    wt = p["wt"].astype(bf16)                               # [Dt, H]
    w1 = p["w1"].astype(bf16)                               # [3H, H]
    w2 = p["w2"].astype(bf16)                               # [H, H//2]
    # Final weight padded from 4 to _OUT_W output lanes (zero columns).
    w3 = jnp.zeros((H2, _OUT_W), jnp.float32).at[:, 0:4].set(p["w3"]).astype(bf16)

    # All six biases in one sublane-padded f32 [8, BW] array (f32 for accuracy).
    BW = max(H, _OUT_W)
    b = jnp.zeros((8, BW), jnp.float32)
    b = b.at[0, 0:H].set(p["bv"][0])
    b = b.at[1, 0:H].set(p["ba"][0])
    b = b.at[2, 0:H].set(p["bt"][0])
    b = b.at[3, 0:H].set(p["b1"][0])
    b = b.at[4, 0:H2].set(p["b2"][0])
    b = b.at[5, 0:4].set(p["b3"][0])

    return dict(wv=wv, wa=wa, wt=wt, w1=w1, w2=w2, w3=w3, b=b,
                dims=dict(H=H, H2=H2, Dv=video_dim, Da=audio_dim, Dt=title_dim))


# ----------------------------------------------------------------------------
# Forward wrapper
# ----------------------------------------------------------------------------
def content_moderator_forward(video_x, audio_x, title_x, packed):
    dims = packed["dims"]
    H, H2 = dims["H"], dims["H2"]
    Dv, Da, Dt = dims["Dv"], dims["Da"], dims["Dt"]

    B = video_x.shape[0]

    # Batch tiling: >=2 grid steps whenever B >= 16 so the "parallel" grid
    # axis can shard across both v7x TensorCores; capped at 1024 rows/tile to
    # amortize the ~0.35us/step overhead at large B.
    if B >= 16:
        TB = min(1024, _round_up(pl.cdiv(B, 2), 8))
    else:
        TB = _round_up(max(B, 1), 8)
    B_pad = _round_up(B, TB)

    def prep(x):
        x = x.astype(jnp.bfloat16)              # bf16 input path (half the DMA bytes)
        if B_pad != B:
            x = jnp.pad(x, ((0, B_pad - B), (0, 0)))
        return x

    xv, xa, xt = prep(video_x), prep(audio_x), prep(title_x)

    kernel = functools.partial(_content_moderator_kernel, H=H, H2=H2)

    def resident(arr):
        # Full-array block, constant index_map -> fetched once, stays in VMEM.
        # TODO(synk): on v7x, add pipeline_mode=pl.Buffered(1) here to avoid a
        # second (never re-fetched) pipeline buffer for these resident operands.
        return pl.BlockSpec(arr.shape, lambda i: (0, 0))

    out = pl.pallas_call(
        kernel,
        out_shape=jax.ShapeDtypeStruct((B_pad, _OUT_W), jnp.float32),
        grid=(B_pad // TB,),
        in_specs=[
            pl.BlockSpec((TB, Dv), lambda i: (i, 0)),   # video_x: batch-tiled
            pl.BlockSpec((TB, Da), lambda i: (i, 0)),   # audio_x: batch-tiled
            pl.BlockSpec((TB, Dt), lambda i: (i, 0)),   # title_x: batch-tiled
            resident(packed["wv"]), resident(packed["wa"]), resident(packed["wt"]),
            resident(packed["w1"]), resident(packed["w2"]), resident(packed["w3"]),
            resident(packed["b"]),
        ],
        out_specs=pl.BlockSpec((TB, _OUT_W), lambda i: (i, 0)),
        compiler_params=pltpu.CompilerParams(
            dimension_semantics=("parallel",),
            vmem_limit_bytes=32 * 1024 * 1024,
        ),
    )(xv, xa, xt,
      packed["wv"], packed["wa"], packed["wt"],
      packed["w1"], packed["w2"], packed["w3"],
      packed["b"])

    # TODO(synk): optionally emit bf16 logits to halve writeback further; kept
    # f32 to preserve logit precision.
    return out[:B, :4]


# ----------------------------------------------------------------------------
# Reference & synthetic init
# ----------------------------------------------------------------------------
def init_params(key, video_dim, audio_dim, title_dim, hidden_dim):
    """Deterministic synthetic parameter init (uniform, PyTorch-Linear-like scale)."""
    ks = jax.random.split(key, 12)

    def linear(kw, kb, fan_in, fan_out):
        bound = 1.0 / jnp.sqrt(float(fan_in))
        w = jax.random.uniform(kw, (fan_in, fan_out), jnp.float32, -bound, bound)
        bb = jax.random.uniform(kb, (1, fan_out), jnp.float32, -bound, bound)
        return w, bb

    wv, bv = linear(ks[0], ks[1], video_dim, hidden_dim)
    wa, ba = linear(ks[2], ks[3], audio_dim, hidden_dim)
    wt, bt = linear(ks[4], ks[5], title_dim, hidden_dim)
    w1, b1 = linear(ks[6], ks[7], hidden_dim * 3, hidden_dim)
    w2, b2 = linear(ks[8], ks[9], hidden_dim, hidden_dim // 2)
    w3, b3 = linear(ks[10], ks[11], hidden_dim // 2, 4)
    return dict(wv=wv, bv=bv, wa=wa, ba=ba, wt=wt, bt=bt,
                w1=w1, b1=b1, w2=w2, b2=b2, w3=w3, b3=b3)


def reference_forward(video_x, audio_x, title_x, p):
    v = jax.nn.relu(video_x @ p["wv"] + p["bv"])
    a = jax.nn.relu(audio_x @ p["wa"] + p["ba"])
    t = jax.nn.relu(title_x @ p["wt"] + p["bt"])
    x = jnp.concatenate([v, a, t], axis=1)
    h1 = jax.nn.relu(x @ p["w1"] + p["b1"])
    h2 = jax.nn.relu(h1 @ p["w2"] + p["b2"])
    return h2 @ p["w3"] + p["b3"]


if __name__ == "__main__":
    batch = 8
    video_dim, audio_dim, title_dim = 32, 16, 24
    hidden_dim = 32

    key = jax.random.PRNGKey(0)
    k_in, k_par = jax.random.split(key)
    kv, ka, kt = jax.random.split(k_in, 3)

    video_x = jax.random.normal(kv, (batch, video_dim), jnp.float32)
    audio_x = jax.random.normal(ka, (batch, audio_dim), jnp.float32)
    title_x = jax.random.normal(kt, (batch, title_dim), jnp.float32)

    params = init_params(k_par, video_dim, audio_dim, title_dim, hidden_dim)
    packed = pack_params(params, video_dim, audio_dim, title_dim, hidden_dim)

    out = content_moderator_forward(video_x, audio_x, title_x, packed)
    out = jax.block_until_ready(out)

    ref = reference_forward(video_x, audio_x, title_x, params)
    assert out.shape == (batch, 4)
    # bf16 inputs/weights with f32 accumulation vs. f32 reference -> loosened tolerance.
    assert jnp.allclose(out, ref, atol=5e-2, rtol=5e-2), (
        float(jnp.max(jnp.abs(out - ref))))

    print("KERNEL_OK")
</pallas_src>

<mosaic_0001>
module attributes {stable_mosaic.version = 11 : i64} {
  func.func @_content_moderator_kernel(%arg0: i32, %arg1: memref<8x32xbf16, #tpu.memory_space<vmem>>, %arg2: memref<8x16xbf16, #tpu.memory_space<vmem>>, %arg3: memref<8x24xbf16, #tpu.memory_space<vmem>>, %arg4: memref<32x32xbf16, #tpu.memory_space<vmem>>, %arg5: memref<16x32xbf16, #tpu.memory_space<vmem>>, %arg6: memref<24x32xbf16, #tpu.memory_space<vmem>>, %arg7: memref<96x32xbf16, #tpu.memory_space<vmem>>, %arg8: memref<32x16xbf16, #tpu.memory_space<vmem>>, %arg9: memref<16x8xbf16, #tpu.memory_space<vmem>>, %arg10: memref<8x32xf32, #tpu.memory_space<vmem>>, %arg11: memref<8x8xf32, #tpu.memory_space<vmem>>) attributes {dimension_semantics = [#tpu.dimension_semantics<parallel>], iteration_bounds = array<i64: 1>, scalar_prefetch = 0 : i64, scratch_operands = 0 : i64, tpu.core_type = #tpu.core_type<tc>, window_params = [{transform_indices = @transform_0, window_bounds = array<i64: 8, 32>}, {transform_indices = @transform_1, window_bounds = array<i64: 8, 16>}, {transform_indices = @transform_2, window_bounds = array<i64: 8, 24>}, {pipeline_mode = #tpu.pipeline_mode<synchronous>, transform_indices = @transform_3, window_bounds = array<i64: 32, 32>}, {pipeline_mode = #tpu.pipeline_mode<synchronous>, transform_indices = @transform_4, window_bounds = array<i64: 16, 32>}, {pipeline_mode = #tpu.pipeline_mode<synchronous>, transform_indices = @transform_5, window_bounds = array<i64: 24, 32>}, {pipeline_mode = #tpu.pipeline_mode<synchronous>, transform_indices = @transform_6, window_bounds = array<i64: 96, 32>}, {pipeline_mode = #tpu.pipeline_mode<synchronous>, transform_indices = @transform_7, window_bounds = array<i64: 32, 16>}, {pipeline_mode = #tpu.pipeline_mode<synchronous>, transform_indices = @transform_8, window_bounds = array<i64: 16, 8>}, {pipeline_mode = #tpu.pipeline_mode<synchronous>, transform_indices = @transform_9, window_bounds = array<i64: 8, 32>}, {transform_indices = @transform_10, window_bounds = array<i64: 8, 8>}]} {
    %c0 = arith.constant 0 : index
    %c0_0 = arith.constant 0 : index
    %0 = vector.load %arg1[%c0, %c0_0] : memref<8x32xbf16, #tpu.memory_space<vmem>>, vector<8x32xbf16>
    %c0_1 = arith.constant 0 : index
    %c0_2 = arith.constant 0 : index
    %1 = vector.load %arg4[%c0_1, %c0_2] : memref<32x32xbf16, #tpu.memory_space<vmem>>, vector<32x32xbf16>
    %cst = arith.constant dense<0.000000e+00> : vector<8x32xf32>
    %2 = tpu.matmul %0, %1, %cst {dimension_numbers = #tpu.dot_dimension_numbers<[1], [0], [0], [1], [0, 0, 1, 1], [], []>} : vector<8x32xbf16>, vector<32x32xbf16>, vector<8x32xf32> -> vector<8x32xf32>
    %c0_3 = arith.constant 0 : index
    %c0_4 = arith.constant 0 : index
    %3 = vector.load %arg10[%c0_3, %c0_4] : memref<8x32xf32, #tpu.memory_space<vmem>>, vector<1x32xf32>
    %4 = vector.broadcast %3 : vector<1x32xf32> to vector<8x32xf32>
    %5 = arith.addf %2, %4 : vector<8x32xf32>
    %cst_5 = arith.constant 0.000000e+00 : f32
    %6 = vector.broadcast %cst_5 : f32 to vector<8x32xf32>
    %7 = arith.maximumf %5, %6 : vector<8x32xf32>
    %c0_6 = arith.constant 0 : index
    %c0_7 = arith.constant 0 : index
    %8 = vector.load %arg2[%c0_6, %c0_7] : memref<8x16xbf16, #tpu.memory_space<vmem>>, vector<8x16xbf16>
    %c0_8 = arith.constant 0 : index
    %c0_9 = arith.constant 0 : index
    %9 = vector.load %arg5[%c0_8, %c0_9] : memref<16x32xbf16, #tpu.memory_space<vmem>>, vector<16x32xbf16>
    %cst_10 = arith.constant dense<0.000000e+00> : vector<8x32xf32>
    %10 = tpu.matmul %8, %9, %cst_10 {dimension_numbers = #tpu.dot_dimension_numbers<[1], [0], [0], [1], [0, 0, 1, 1], [], []>} : vector<8x16xbf16>, vector<16x32xbf16>, vector<8x32xf32> -> vector<8x32xf32>
    %c1 = arith.constant 1 : index
    %c0_11 = arith.constant 0 : index
    %11 = vector.load %arg10[%c1, %c0_11] : memref<8x32xf32, #tpu.memory_space<vmem>>, vector<1x32xf32>
    %12 = vector.broadcast %11 : vector<1x32xf32> to vector<8x32xf32>
    %13 = arith.addf %10, %12 : vector<8x32xf32>
    %cst_12 = arith.constant 0.000000e+00 : f32
    %14 = vector.broadcast %cst_12 : f32 to vector<8x32xf32>
    %15 = arith.maximumf %13, %14 : vector<8x32xf32>
    %c0_13 = arith.constant 0 : index
    %c0_14 = arith.constant 0 : index
    %16 = vector.load %arg3[%c0_13, %c0_14] : memref<8x24xbf16, #tpu.memory_space<vmem>>, vector<8x24xbf16>
    %c0_15 = arith.constant 0 : index
    %c0_16 = arith.constant 0 : index
    %17 = vector.load %arg6[%c0_15, %c0_16] : memref<24x32xbf16, #tpu.memory_space<vmem>>, vector<24x32xbf16>
    %cst_17 = arith.constant dense<0.000000e+00> : vector<8x32xf32>
    %18 = tpu.matmul %16, %17, %cst_17 {dimension_numbers = #tpu.dot_dimension_numbers<[1], [0], [0], [1], [0, 0, 1, 1], [], []>} : vector<8x24xbf16>, vector<24x32xbf16>, vector<8x32xf32> -> vector<8x32xf32>
    %c2 = arith.constant 2 : index
    %c0_18 = arith.constant 0 : index
    %19 = vector.load %arg10[%c2, %c0_18] : memref<8x32xf32, #tpu.memory_space<vmem>>, vector<1x32xf32>
    %20 = vector.broadcast %19 : vector<1x32xf32> to vector<8x32xf32>
    %21 = arith.addf %18, %20 : vector<8x32xf32>
    %cst_19 = arith.constant 0.000000e+00 : f32
    %22 = vector.broadcast %cst_19 : f32 to vector<8x32xf32>
    %23 = arith.maximumf %21, %22 : vector<8x32xf32>
    %24 = arith.truncf %7 : vector<8x32xf32> to vector<8x32xbf16>
    %c0_20 = arith.constant 0 : index
    %c0_21 = arith.constant 0 : index
    %25 = vector.load %arg7[%c0_20, %c0_21] : memref<96x32xbf16, #tpu.memory_space<vmem>>, vector<32x32xbf16>
    %cst_22 = arith.constant dense<0.000000e+00> : vector<8x32xf32>
    %26 = tpu.matmul %24, %25, %cst_22 {dimension_numbers = #tpu.dot_dimension_numbers<[1], [0], [0], [1], [0, 0, 1, 1], [], []>} : vector<8x32xbf16>, vector<32x32xbf16>, vector<8x32xf32> -> vector<8x32xf32>
    %27 = arith.truncf %15 : vector<8x32xf32> to vector<8x32xbf16>
    %c32 = arith.constant 32 : index
    %c0_23 = arith.constant 0 : index
    %28 = vector.load %arg7[%c32, %c0_23] : memref<96x32xbf16, #tpu.memory_space<vmem>>, vector<32x32xbf16>
    %cst_24 = arith.constant dense<0.000000e+00> : vector<8x32xf32>
    %29 = tpu.matmul %27, %28, %cst_24 {dimension_numbers = #tpu.dot_dimension_numbers<[1], [0], [0], [1], [0, 0, 1, 1], [], []>} : vector<8x32xbf16>, vector<32x32xbf16>, vector<8x32xf32> -> vector<8x32xf32>
    %30 = arith.addf %26, %29 : vector<8x32xf32>
    %31 = arith.truncf %23 : vector<8x32xf32> to vector<8x32xbf16>
    %c64 = arith.constant 64 : index
    %c0_25 = arith.constant 0 : index
    %32 = vector.load %arg7[%c64, %c0_25] : memref<96x32xbf16, #tpu.memory_space<vmem>>, vector<32x32xbf16>
    %cst_26 = arith.constant dense<0.000000e+00> : vector<8x32xf32>
    %33 = tpu.matmul %31, %32, %cst_26 {dimension_numbers = #tpu.dot_dimension_numbers<[1], [0], [0], [1], [0, 0, 1, 1], [], []>} : vector<8x32xbf16>, vector<32x32xbf16>, vector<8x32xf32> -> vector<8x32xf32>
    %34 = arith.addf %30, %33 : vector<8x32xf32>
    %c3 = arith.constant 3 : index
    %c0_27 = arith.constant 0 : index
    %35 = vector.load %arg10[%c3, %c0_27] : memref<8x32xf32, #tpu.memory_space<vmem>>, vector<1x32xf32>
    %36 = vector.broadcast %35 : vector<1x32xf32> to vector<8x32xf32>
    %37 = arith.addf %34, %36 : vector<8x32xf32>
    %cst_28 = arith.constant 0.000000e+00 : f32
    %38 = vector.broadcast %cst_28 : f32 to vector<8x32xf32>
    %39 = arith.maximumf %37, %38 : vector<8x32xf32>
    %40 = arith.truncf %39 : vector<8x32xf32> to vector<8x32xbf16>
    %c0_29 = arith.constant 0 : index
    %c0_30 = arith.constant 0 : index
    %41 = vector.load %arg8[%c0_29, %c0_30] : memref<32x16xbf16, #tpu.memory_space<vmem>>, vector<32x16xbf16>
    %cst_31 = arith.constant dense<0.000000e+00> : vector<8x16xf32>
    %42 = tpu.matmul %40, %41, %cst_31 {dimension_numbers = #tpu.dot_dimension_numbers<[1], [0], [0], [1], [0, 0, 1, 1], [], []>} : vector<8x32xbf16>, vector<32x16xbf16>, vector<8x16xf32> -> vector<8x16xf32>
    %c4 = arith.constant 4 : index
    %c0_32 = arith.constant 0 : index
    %43 = vector.load %arg10[%c4, %c0_32] : memref<8x32xf32, #tpu.memory_space<vmem>>, vector<1x16xf32>
    %44 = vector.broadcast %43 : vector<1x16xf32> to vector<8x16xf32>
    %45 = arith.addf %42, %44 : vector<8x16xf32>
    %cst_33 = arith.constant 0.000000e+00 : f32
    %46 = vector.broadcast %cst_33 : f32 to vector<8x16xf32>
    %47 = arith.maximumf %45, %46 : vector<8x16xf32>
    %48 = arith.truncf %47 : vector<8x16xf32> to vector<8x16xbf16>
    %c0_34 = arith.constant 0 : index
    %c0_35 = arith.constant 0 : index
    %49 = vector.load %arg9[%c0_34, %c0_35] : memref<16x8xbf16, #tpu.memory_space<vmem>>, vector<16x8xbf16>
    %cst_36 = arith.constant dense<0.000000e+00> : vector<8x8xf32>
    %50 = tpu.matmul %48, %49, %cst_36 {dimension_numbers = #tpu.dot_dimension_numbers<[1], [0], [0], [1], [0, 0, 1, 1], [], []>} : vector<8x16xbf16>, vector<16x8xbf16>, vector<8x8xf32> -> vector<8x8xf32>
    %c5 = arith.constant 5 : index
    %c0_37 = arith.constant 0 : index
    %51 = vector.load %arg10[%c5, %c0_37] : memref<8x32xf32, #tpu.memory_space<vmem>>, vector<1x8xf32>
    %52 = vector.broadcast %51 : vector<1x8xf32> to vector<8x8xf32>
    %53 = arith.addf %50, %52 : vector<8x8xf32>
    %c0_38 = arith.constant 0 : index
    %c0_39 = arith.constant 0 : index
    %54 = vector.load %arg11[%c0_38, %c0_39] : memref<8x8xf32, #tpu.memory_space<vmem>>, vector<8x8xf32>
    tpu.vector_store %arg11[%c0_38, %c0_39], %53 {strides = array<i32>} : memref<8x8xf32, #tpu.memory_space<vmem>>, vector<8x8xf32>,
    return
  }
  func.func @transform_0(%arg0: i32) -> (i32, i32) {
    %c0_i32 = arith.constant 0 : i32
    %c0_i32_0 = arith.constant 0 : i32
    return %arg0, %c0_i32 : i32, i32
  }
  func.func @transform_1(%arg0: i32) -> (i32, i32) {
    %c0_i32 = arith.constant 0 : i32
    %c0_i32_0 = arith.constant 0 : i32
    return %arg0, %c0_i32 : i32, i32
  }
  func.func @transform_2(%arg0: i32) -> (i32, i32) {
    %c0_i32 = arith.constant 0 : i32
    %c0_i32_0 = arith.constant 0 : i32
    return %arg0, %c0_i32 : i32, i32
  }
  func.func @transform_3(%arg0: i32) -> (i32, i32) {
    %c0_i32 = arith.constant 0 : i32
    %c0_i32_0 = arith.constant 0 : i32
    %c0_i32_1 = arith.constant 0 : i32
    return %c0_i32, %c0_i32_0 : i32, i32
  }
  func.func @transform_4(%arg0: i32) -> (i32, i32) {
    %c0_i32 = arith.constant 0 : i32
    %c0_i32_0 = arith.constant 0 : i32
    %c0_i32_1 = arith.constant 0 : i32
    return %c0_i32, %c0_i32_0 : i32, i32
  }
  func.func @transform_5(%arg0: i32) -> (i32, i32) {
    %c0_i32 = arith.constant 0 : i32
    %c0_i32_0 = arith.constant 0 : i32
    %c0_i32_1 = arith.constant 0 : i32
    return %c0_i32, %c0_i32_0 : i32, i32
  }
  func.func @transform_6(%arg0: i32) -> (i32, i32) {
    %c0_i32 = arith.constant 0 : i32
    %c0_i32_0 = arith.constant 0 : i32
    %c0_i32_1 = arith.constant 0 : i32
    return %c0_i32, %c0_i32_0 : i32, i32
  }
  func.func @transform_7(%arg0: i32) -> (i32, i32) {
    %c0_i32 = arith.constant 0 : i32
    %c0_i32_0 = arith.constant 0 : i32
    %c0_i32_1 = arith.constant 0 : i32
    return %c0_i32, %c0_i32_0 : i32, i32
  }
  func.func @transform_8(%arg0: i32) -> (i32, i32) {
    %c0_i32 = arith.constant 0 : i32
    %c0_i32_0 = arith.constant 0 : i32
    %c0_i32_1 = arith.constant 0 : i32
    return %c0_i32, %c0_i32_0 : i32, i32
  }
  func.func @transform_9(%arg0: i32) -> (i32, i32) {
    %c0_i32 = arith.constant 0 : i32
    %c0_i32_0 = arith.constant 0 : i32
    %c0_i32_1 = arith.constant 0 : i32
    return %c0_i32, %c0_i32_0 : i32, i32
  }
  func.func @transform_10(%arg0: i32) -> (i32, i32) {
    %c0_i32 = arith.constant 0 : i32
    %c0_i32_0 = arith.constant 0 : i32
    return %arg0, %c0_i32 : i32, i32
  }
}

</mosaic_0001>

<bundles_post_ra>
// kernel: tpu_custom_call.1
= control target key start
LH: loop header
LB: loop body
LE: loop exit
PB: predicated region body
PF: predicated region fallthrough
CT: control target
= control target key end

     0   :  { %v708_v1 = vmov 0.0   ;;  %vm709_vm0 = vmmov 0   ;;  %vm118_vm1 = vcmask 130048   ;;  %vm185_vm2 = vcmask 1043456   ;;  %s884_s0 = inlined_call_operand.vmem [shape: bf16[8,32], index: 0, kind: input, shape index: {}]   ;;  %s885_s1 = inlined_call_operand.vmem [shape: bf16[8,16], index: 1, kind: input, shape index: {}]   ;;  %s886_s2 = inlined_call_operand.vmem [shape: bf16[8,24], index: 2, kind: input, shape index: {}]   ;;  %s887_s3 = inlined_call_operand.vmem [shape: bf16[32,32], index: 3, kind: input, shape index: {}]   ;;  %s888_s4 = inlined_call_operand.vmem [shape: bf16[16,32], index: 4, kind: input, shape index: {}]   ;;  %s889_s5 = inlined_call_operand.vmem [shape: bf16[24,32], index: 5, kind: input, shape index: {}]   ;;  %s890_s6 = inlined_call_operand.vmem [shape: bf16[96,32], index: 6, kind: input, shape index: {}]   ;;  %s891_s7 = inlined_call_operand.vmem [shape: bf16[32,16], index: 7, kind: input, shape index: {}]   ;;  %s892_s8 = inlined_call_operand.vmem [shape: bf16[16,8], index: 8, kind: input, shape index: {}]   ;;  %s893_s9 = inlined_call_operand.vmem [shape: f32[8,32], index: 9, kind: input, shape index: {}]   ;;  %s894_s10 = inlined_call_operand.hbm [shape: f32[8,8], index: 10, kind: output, shape index: {}]  }
   0x1   :  { %v670_v0 = vld [vmem:[%s887_s3] sm:$0xff]   ;;  %607 = vmatprep.subr.bf16.mxu0 %v708_v1  ;;  %615 = vmatprep.subr.bf16.mxu1 %v708_v1  ;;  %v672_v4 = vld [vmem:[%s887_s3 + $0x8] sm:$0xff]   ;;  %vm59_vm3 = vcmask 261120   ;;  %vm181_vm4 = vcmask 195584  }
   0x2   :  { %v671_v2 = vld [vmem:[%s888_s4] sm:$0xff]   ;;  %608 = vmatpush3.bf16.msra.mxu0 %v670_v0  ;;  %617 = vmatprep.mubr.msk.bf16.mxu1 %vm709_vm0, %v708_v1  ;;  %v674_v7 = vld [vmem:[%s889_s5 + $0x8] ss:$0 sps:$4 sm:$0xff]  }
   0x3   :  { %v104_v3 = vld [vmem:[%s885_s1] sm:$0xf]  ;;  %616 = vmatpush3.bf16.msra.mxu1 %v671_v2  ;;  %609 = vmatprep.subr.bf16.mxu0 %v708_v1  ;;  %v187_v8 = vsel %vm185_vm2, %v674_v7, 0 }
   0x4   :  { %621 = vmatprep.subr.bf16.mxu1 %v708_v1  ;;  %v673_v5 = vld [vmem:[%s889_s5] sm:$0xff]   ;;  %611 = vmatprep.mubr.msk.bf16.mxu0 %vm709_vm0, %v708_v1 }
   0x5   :  { %v37_v6 = vld [vmem:[%s884_s0] sm:$0xf] }
   0x6   :  { %618 = vmatmul.mubr.msk.bf16.vlgmr.msra.gmra.mrb[0].mxu1 %vm118_vm1, %v104_v3  ;;  %610 = vmatpush3.bf16.msra.mxu0 %v672_v4  ;;  %v163_v9 = vld [vmem:[%s886_s2] sm:$0xf] }
   0x7   :  { %622 = vmatpush3.bf16.msra.mxu1 %v673_v5  ;;  %625 = vmatprep.mubr.msk.bf16.mxu1 %vm709_vm0, %v708_v1 }
   0x8   :  { %623 = vmatprep.subr.bf16.mxu1 %v708_v1  ;;  %629 = vmatprep.subr.bf16.mxu0 %v708_v1 }
   0x9   :  { %612 = vmatmul.mubr.msk.bf16.vlgmr.msra.gmra.mrb[0].mxu0 %vm59_vm3, %v37_v6 }
   0xa   :  { %633 = vmatprep.mubr.msk.bf16.mxu0 %vm709_vm0, %v708_v1 }
   0xb   :  { %624 = vmatpush3.bf16.msra.mxu1 %v187_v8 }
   0xc   :  { %637 = vmatprep.subr.bf16.mxu1 %v708_v1 }
   0xd   :  { %15 = vsyncpa [#allocation3], 0  ;;  %v675_v10 = vld [vmem:[%s890_s6 + $0x10] sm:$0xff]   ;;  %v676_v11 = vld [vmem:[%s890_s6 + $0x18] sm:$0xff]   ;;  %s710_s26 = smov [#allocation2]   ;;  %vm541_vm5 = vcmask 64512  }
   0xe   :  { %626 = vmatmul.mubr.msk.bf16.vlgmr.msra.gmra.mrb[4].mxu1 %vm181_vm4, %v163_v9  ;;  %630 = vmatpush3.bf16.msra.mxu0 %v675_v10  ;;  %v677_v12 = vld [vmem:[%s890_s6] sm:$0xff]   ;;  %v678_v13 = vld [vmem:[%s890_s6 + $0x8] sm:$0xff]  }
   0xf   :  { %641 = vmatprep.mubr.msk.bf16.mxu1 %vm709_vm0, %v708_v1  ;;  %631 = vmatprep.subr.bf16.mxu0 %v708_v1  ;;  %v561_v14 = vld [vmem:[%s893_s9 + $0x1] ss:$0 sm:$0xff]  ;;  %v557_v18 = vld [vmem:[%s893_s9] ss:$0 sm:$0xff]  ;;  %v564_v30 = vld [vmem:[%s893_s9 + $0x2] ss:$0 sm:$0xff] }
  0x10   :  { %638 = vmatpush3.bf16.msra.mxu1 %v677_v12  ;;  %v679_v25 = vld [vmem:[%s890_s6 + $0x20] sm:$0xff]   ;;  %v680_v33 = vld [vmem:[%s890_s6 + $0x28] sm:$0xff]  }
  0x11   :  { %639 = vmatprep.subr.bf16.mxu1 %v708_v1  ;;  %v681_v40 = vld [vmem:[%s891_s7] sm:$0xff]   ;;  %v682_v41 = vld [vmem:[%s891_s7 + $0x8] sm:$0xff]  }
  0x12   :  { %632 = vmatpush3.bf16.msra.mxu0 %v676_v11  ;;  %v577_v52 = vld [vmem:[%s893_s9 + $0x3] ss:$0 sm:$0xff]  ;;  %v578_v61 = vld [vmem:[%s893_s9 + $0x4] ss:$0 sm:$0xff]  ;;  %v582_v5 = vld [vmem:[%s893_s9 + $0x5] ss:$0 sm:$0xff] }
  0x13   :  { %645 = vmatprep.subr.bf16.mxu0 %v708_v1  ;;  %v683_v60 = vld [vmem:[%s892_s8] sm:$0xff]   ;;  %s549_s8 = sshll.u32 %s710_s26, 4  ;;  %s550_s8 = int_to_ptr.vmem [resolvable:$true] %s549_s8 }
  0x14   :  { %640 = vmatpush3.bf16.msra.mxu1 %v678_v13  ;;  %s684_s2 = scalar_lea.vmem %s550_s8, 128  ;;  %p689_p1 = scmp.lt.s32.totalorder %s550_s8, %s550_s8 }
  0x15   :  { %653 = vmatprep.subr.bf16.mxu1 %v708_v1  ;;  %p685_p0 = scmp.ne.s32.totalorder %s550_s8, %s684_s2  ;;  %p690_p2 = scmp.lt.s32.totalorder %s684_s2, %s684_s2 }
  0x17   :  { %p691_p3 = por %p690_p2, %p689_p1 }
  0x19   :  { %p692_p4 = pnand %p691_p3, %p685_p0 }
  0xd9   :  { %v156_v15 = vpop.f32.mrb[0].mxu1 }
  0xda   :  { %v157_v16 = vadd.f32 %v561_v14, %v156_v15  ;;  %v619_v17 = vpop.f32.mrb[1].mxu1 }
  0xdb   :  { %v159_v19 = vpop.f32.mrb[2].mxu1 }
  0xdc   :  { %v162_v20 = vmax.f32 %v157_v16, 0.0  ;;  %v620_v21 = vpop.f32.mrb[3].mxu1  ;;  %v97_v22 = vpop.f32.mrb[0].mxu0 }
  0xdd   :  { %v98_v23 = vadd.f32 %v557_v18, %v97_v22  ;;  %v613_v24 = vpop.f32.mrb[1].mxu0 }
  0xde   :  { %v235_v26 = vpack.c.bf16 %v162_v20, %v162_v20  ;;  %v100_v27 = vpop.f32.mrb[2].mxu0 }
  0xdf   :  { %v103_v28 = vmax.f32 %v98_v23, 0.0  ;;  %v614_v29 = vpop.f32.mrb[3].mxu0 }
  0xe0   :  { %634 = vmatmul.mubr.msk.bf16.vlgmr.msra.gmra.mrb[4].mxu0 %vm59_vm3, %v235_v26 }
  0xe1   :  { %v230_v31 = vpack.c.bf16 %v103_v28, %v103_v28  ;;  %v223_v32 = vpop.f32.mrb[4].mxu1  ;;  %646 = vmatpush3.bf16.msra.mxu0 %v679_v25  ;;  %649 = vmatprep.mubr.msk.bf16.mxu0 %vm709_vm0, %v708_v1 }
  0xe2   :  { %v224_v34 = vadd.f32 %v564_v30, %v223_v32  ;;  %v627_v35 = vpop.f32.mrb[5].mxu1  ;;  %647 = vmatprep.subr.bf16.mxu0 %v708_v1 }
  0xe3   :  { %v226_v36 = vpop.f32.mrb[6].mxu1  ;;  %642 = vmatmul.mubr.msk.bf16.vlgmr.msra.gmra.mrb[8].mxu1 %vm59_vm3, %v230_v31 }
  0xe4   :  { %v229_v37 = vmax.f32 %v224_v34, 0.0  ;;  %v628_v38 = vpop.f32.mrb[7].mxu1  ;;  %657 = vmatprep.mubr.msk.bf16.mxu1 %vm709_vm0, %v708_v1  ;;  %654 = vmatpush3.bf16.msra.mxu1 %v681_v40 }
  0xe5   :  { %648 = vmatpush3.bf16.msra.mxu0 %v680_v33  ;;  %655 = vmatprep.subr.bf16.mxu1 %v708_v1 }
  0xe6   :  { %v350_v39 = vpack.c.bf16 %v229_v37, %v229_v37  ;;  %661 = vmatprep.subr.bf16.mxu0 %v708_v1 }
  0xe8   :  { %650 = vmatmul.mubr.msk.bf16.vlgmr.msra.gmra.mrb[8].mxu0 %vm59_vm3, %v350_v39  ;;  %656 = vmatpush3.bf16.msra.mxu1 %v682_v41 }
  0xe9   :  { %663 = vmatprep.mubr.msk.bf16.mxu0 %vm709_vm0, %v708_v1  ;;  %662 = vmatpush3.bf16.msra.mxu0 %v683_v60 }
 0x1b3   :  { %v289_v42 = vpop.f32.mrb[4].mxu0 }
 0x1b4   :  { %v635_v43 = vpop.f32.mrb[5].mxu0 }
 0x1b5   :  { %v292_v44 = vpop.f32.mrb[6].mxu0 }
 0x1b6   :  { %v636_v45 = vpop.f32.mrb[7].mxu0  ;;  %v344_v46 = vpop.f32.mrb[8].mxu1 }
 0x1b7   :  { %v345_v47 = vadd.f32 %v344_v46, %v289_v42  ;;  %v643_v48 = vpop.f32.mrb[9].mxu1 }
 0x1b8   :  { %v347_v49 = vpop.f32.mrb[10].mxu1 }
 0x1b9   :  { %v644_v50 = vpop.f32.mrb[11].mxu1 }
 0x1bb   :  { %v404_v51 = vpop.f32.mrb[8].mxu0 }
 0x1bc   :  { %v410_v53 = vadd.f32 %v404_v51, %v345_v47  ;;  %v651_v54 = vpop.f32.mrb[9].mxu0 }
 0x1bd   :  { %v407_v55 = vpop.f32.mrb[10].mxu0 }
 0x1be   :  { %v416_v56 = vadd.f32 %v577_v52, %v410_v53  ;;  %v652_v57 = vpop.f32.mrb[11].mxu0 }
 0x1c0   :  { %v417_v58 = vmax.f32 %v416_v56, 0.0 }
 0x1c2   :  { %v418_v59 = vpack.c.bf16 %v417_v58, %v417_v58 }
 0x1c4   :  { %658 = vmatmul.mubr.msk.bf16.vlgmr.msra.gmra.mrb[12].mxu1 %vm59_vm3, %v418_v59 }
 0x297   :  { %v477_v62 = vpop.f32.mrb[12].mxu1 }
 0x298   :  { %v478_v63 = vadd.f32 %v578_v61, %v477_v62  ;;  %v659_v0 = vpop.f32.mrb[13].mxu1 }
 0x299   :  { %v480_v1 = vpop.f32.mrb[14].mxu1 }
 0x29a   :  { %v483_v2 = vmax.f32 %v478_v63, 0.0  ;;  %v660_v3 = vpop.f32.mrb[15].mxu1 }
 0x29c   :  { %v484_v4 = vpack.c.bf16 %v483_v2, %v483_v2 }
 0x29e   :  { %664 = vmatmul.mubr.msk.bf16.vlgmr.msra.gmra.mrb[12].mxu0 %vm118_vm1, %v484_v4 }
 0x371   :  { %v535_v6 = vpop.f32.mrb[12].mxu0 }
 0x372   :  { %v536_v7 = vadd.f32 %v582_v5, %v535_v6  ;;  %v665_v8 = vpop.f32.mrb[13].mxu0 }
 0x373   :  { %v538_v9 = vpop.f32.mrb[14].mxu0 }
 0x374   :  { %v666_v10 = vpop.f32.mrb[15].mxu0  ;;  %542 = vst.msk [vmem:[#allocation2] sm:$0xff] %vm541_vm5, %v536_v7 }
 0x375   :  { %695 = shalt.err (!%p692_p4)
}
 0x376   :  { %s696_s9 = scalar_lea.hbm %s894_s10, 128 }
 0x377   :  { %p697_p5 = scmp.ne.s32.totalorder %s894_s10, %s696_s9  ;;  %p700_p6 = scmp.lt.u32.totalorder %s696_s9, %s894_s10 }
 0x379   :  { %p702_p7 = pnand %p700_p6, %p697_p5 }
 0x37b   :  { %705 = shalt.err (!%p702_p7)
}
 0x37c   :  { %552 = dma.vmem_to_hbm [thread:$0]  %s550_s8, 128, %s894_s10, [#allocation3]  }
 0x37d   :  { %706 = dma.done.wait [#allocation3], 128  }
 0x37e   :  { %707 = vsyncadd [#allocation3], 4294967168 }
 0x37f   :  { %556 = vsyncpa [#allocation3], 1 }

</bundles_post_ra>
